<compile_context>
chip_gen: v7x
topology: tpu7x:2x2x1
jax: 0.10.0
libtpu: 0.0.40
codegen_flags: <defaults>
</compile_context>

<pallas_src>
import functools

import jax
import jax.numpy as jnp
from jax import lax
from jax.experimental import pallas as pl
from jax.experimental.pallas import tpu as pltpu


def _round_up(x, m):
    return (x + m - 1) // m * m


# --------------------------------------------------------------------------
# Kernel: one batch tile, fused 2-layer tanh MLP + fused (alphas|sigmas|means)
# heads, compact (full-lane-dim) outputs, in-kernel clamp.
# --------------------------------------------------------------------------
def _gmn_kernel(x_ref, w1_ref, b1_ref, w2_ref, wh_ref,
                alphas_ref, log_sigmas_ref, means_ref,
                *, bias_lane, mixture_size, targets):
    compute_dtype = w1_ref.dtype
    h_pad = w2_ref.shape[0]

    # (1, h_pad) mask for the constant-1 bias-carrier lane (broadcasts rows).
    lane_idx = lax.broadcasted_iota(jnp.int32, (1, h_pad), 1)
    is_bias_lane = lane_idx == bias_lane

    # Cast the streamed tile in-kernel (no wrapper-side cast pass).
    x = x_ref[...].astype(compute_dtype)

    # Layer 1: MXU matmul (f32 accumulate) + tiny resident bias on the VPU.
    h1 = jnp.tanh(
        jnp.dot(x, w1_ref[...], preferred_element_type=jnp.float32)
        + b1_ref[...]
    )
    # Inject the constant-1 bias-carrier lane.  It propagates through layer 2
    # via the literal 1.0 stored at w2[bias_lane, bias_lane]; row `bias_lane`
    # of w2 / wh carries b2 and the concatenated head biases.
    h1 = jnp.where(is_bias_lane, 1.0, h1).astype(compute_dtype)

    h2 = jnp.dot(h1, w2_ref[...], preferred_element_type=jnp.float32)
    h2 = h2.astype(compute_dtype)

    # Fused heads: columns = [alphas | log_sigmas | means | zero pad].
    heads = jnp.dot(h2, wh_ref[...], preferred_element_type=jnp.float32)

    m = mixture_size
    tm = targets * mixture_size
    alphas_ref[...] = heads[:, :m]
    log_sigmas_ref[...] = jnp.maximum(heads[:, m:m + tm], -5.0)
    means_ref[...] = heads[:, m + tm:m + 2 * tm]


# --------------------------------------------------------------------------
# Parameter packing: fuse heads, fold layer-2/head biases into the weights
# via a bias-carrier lane; layer-1 bias stays a tiny (1, h_pad) f32 operand.
# --------------------------------------------------------------------------
def _pack_params(params, input_dim, hidden_dim, mixture_size, targets, dtype):
    h_pad = _round_up(hidden_dim + 1, 128)          # +1 bias-carrier lane
    out_dim = mixture_size + 2 * targets * mixture_size
    out_pad = _round_up(out_dim, 128)
    bias_lane = hidden_dim

    w1 = jnp.zeros((input_dim, h_pad), dtype)
    w1 = w1.at[:, :hidden_dim].set(params["w1"].astype(dtype))

    b1 = jnp.zeros((1, h_pad), jnp.float32)
    b1 = b1.at[0, :hidden_dim].set(params["b1"].reshape(-1).astype(jnp.float32))

    w2 = jnp.zeros((h_pad, h_pad), dtype)
    w2 = w2.at[:hidden_dim, :hidden_dim].set(params["w2"].astype(dtype))
    w2 = w2.at[bias_lane, :hidden_dim].set(params["b2"].reshape(-1).astype(dtype))
    # Propagate the constant-1 lane through layer 2 (removes a kernel where).
    w2 = w2.at[bias_lane, bias_lane].set(jnp.asarray(1.0, dtype))

    wh_cat = jnp.concatenate([params["wa"], params["ws"], params["wm"]], axis=1)
    bh_cat = jnp.concatenate(
        [params["ba"].reshape(-1), params["bs"].reshape(-1), params["bm"].reshape(-1)]
    )
    wh = jnp.zeros((h_pad, out_pad), dtype)
    wh = wh.at[:hidden_dim, :out_dim].set(wh_cat.astype(dtype))
    wh = wh.at[bias_lane, :out_dim].set(bh_cat.astype(dtype))

    return w1, b1, w2, wh, h_pad, out_pad, bias_lane


def _vmem_cap_bytes():
    try:
        return int(pltpu.get_tpu_info().vmem_capacity_bytes)
    except Exception:
        return 64 * 1024 * 1024  # conservative default (v7x per-TC VMEM)


# --------------------------------------------------------------------------
# Wrapper
# --------------------------------------------------------------------------
def gmn_forward(x, params, mixture_size, targets, *, block_rows=2048,
                dtype=jnp.bfloat16):
    """Pallas-backed forward.  Returns (alphas, means, log_sigmas) with the
    same shapes/semantics as GaussianMixtureNetwork.forward.

    dtype: weight / MXU-operand dtype (bf16 default; accumulation and tanh
    stay f32).  Pass dtype=jnp.float32 for bit-accurate f32 behaviour.
    x is streamed at its own dtype and width; pass bf16 x to halve input
    HBM traffic."""
    n, input_dim = x.shape
    hidden_dim = params["w2"].shape[0]

    w1, b1, w2, wh, h_pad, out_pad, bias_lane = _pack_params(
        params, input_dim, hidden_dim, mixture_size, targets, dtype
    )

    m = mixture_size
    tm = targets * mixture_size

    # Batch tile: ~>=8 grid steps for large batches (pipelining + v7x's two
    # TensorCores on the "parallel" axis), >=256-row floor (per-step overhead),
    # capped at block_rows; sublane-rounded for the streamed x dtype.
    x_itemsize = jnp.dtype(x.dtype).itemsize
    sublane = 16 if x_itemsize < 4 else 8
    tn = _round_up(max(pl.cdiv(n, 8), 1), sublane)
    tn = max(256, tn)
    tn = min(tn, block_rows)
    tn = min(tn, _round_up(n, sublane))   # small batches: one (or few) tiles
    tn = max(tn, sublane)
    grid = (pl.cdiv(n, tn),)

    # Generation-aware VMEM budget: double-buffered x/out tiles + weights +
    # activation headroom, capped at ~75% of physical VMEM for this chip.
    itemsize = jnp.dtype(dtype).itemsize
    est_bytes = (
        2 * tn * _round_up(input_dim, 128) * x_itemsize          # x tiles
        + 3 * 2 * tn * 128 * 4                                   # out tiles
        + 2 * (input_dim * h_pad + h_pad + h_pad * h_pad + h_pad * out_pad) * 4
        + 4 * tn * h_pad * 4                                     # activations
    )
    vmem_limit = int(min(max(2 * est_bytes, 16 * 1024 * 1024),
                         (_vmem_cap_bytes() * 3) // 4))

    kernel = functools.partial(
        _gmn_kernel, bias_lane=bias_lane, mixture_size=mixture_size,
        targets=targets
    )

    alphas, log_sigmas, means = pl.pallas_call(
        kernel,
        out_shape=(
            jax.ShapeDtypeStruct((n, m), jnp.float32),
            jax.ShapeDtypeStruct((n, tm), jnp.float32),
            jax.ShapeDtypeStruct((n, tm), jnp.float32),
        ),
        grid_spec=pltpu.PrefetchScalarGridSpec(
            num_scalar_prefetch=0,
            grid=grid,
            in_specs=[
                pl.BlockSpec((tn, input_dim), lambda i: (i, 0)),     # x (streamed)
                pl.BlockSpec((input_dim, h_pad), lambda i: (0, 0)),  # w1 (resident)
                pl.BlockSpec((1, h_pad), lambda i: (0, 0)),          # b1 (resident)
                pl.BlockSpec((h_pad, h_pad), lambda i: (0, 0)),      # w2 (resident)
                pl.BlockSpec((h_pad, out_pad), lambda i: (0, 0)),    # fused heads
            ],
            out_specs=[
                pl.BlockSpec((tn, m), lambda i: (i, 0)),
                pl.BlockSpec((tn, tm), lambda i: (i, 0)),
                pl.BlockSpec((tn, tm), lambda i: (i, 0)),
            ],
        ),
        compiler_params=pltpu.CompilerParams(
            dimension_semantics=("parallel",),
            vmem_limit_bytes=vmem_limit,
        ),
    )(x, w1, b1, w2, wh)

    # Only free reshapes remain in the wrapper (clamp/slice done in-kernel).
    return (alphas,
            means.reshape(n, targets, mixture_size),
            log_sigmas.reshape(n, targets, mixture_size))


# --------------------------------------------------------------------------
# Init + pure-JAX reference
# --------------------------------------------------------------------------
def init_params(key, input_dim, hidden_dim, mixture_size, targets):
    """PyTorch-Linear-style init U[-1/sqrt(fan_in), 1/sqrt(fan_in)].
    Weights stored as [in, out]."""
    def linear(k, fan_in, fan_out):
        kw, kb = jax.random.split(k)
        bound = 1.0 / jnp.sqrt(jnp.float32(fan_in))
        w = jax.random.uniform(kw, (fan_in, fan_out), jnp.float32, -bound, bound)
        b = jax.random.uniform(kb, (1, fan_out), jnp.float32, -bound, bound)
        return w, b

    k1, k2, ka, ks, km = jax.random.split(key, 5)
    w1, b1 = linear(k1, input_dim, hidden_dim)
    w2, b2 = linear(k2, hidden_dim, hidden_dim)
    wa, ba = linear(ka, hidden_dim, mixture_size)
    ws, bs = linear(ks, hidden_dim, mixture_size * targets)
    wm, bm = linear(km, hidden_dim, mixture_size * targets)
    return dict(w1=w1, b1=b1, w2=w2, b2=b2, wa=wa, ba=ba,
                ws=ws, bs=bs, wm=wm, bm=bm)


def gmn_forward_ref(x, params, mixture_size, targets):
    """Pure-JAX reference for verification."""
    hi = jax.lax.Precision.HIGHEST
    h1 = jnp.tanh(jnp.dot(x, params["w1"], precision=hi) + params["b1"])
    hidden = jnp.dot(h1, params["w2"], precision=hi) + params["b2"]
    alphas = (jnp.dot(hidden, params["wa"], precision=hi) + params["ba"]
              ).reshape(-1, mixture_size)
    log_sigmas = jnp.maximum(
        (jnp.dot(hidden, params["ws"], precision=hi) + params["bs"]
         ).reshape(-1, targets, mixture_size),
        -5.0,
    )
    means = (jnp.dot(hidden, params["wm"], precision=hi) + params["bm"]
             ).reshape(-1, targets, mixture_size)
    return alphas, means, log_sigmas


if __name__ == "__main__":
    # Small shapes consistent with the module's forward: inputs [N, input_dim].
    N, input_dim, hidden_dim = 8, 16, 32
    mixture_size, targets = 4, 3

    key = jax.random.PRNGKey(0)
    kx, kp = jax.random.split(key)
    x = jax.random.normal(kx, (N, input_dim), jnp.float32)
    params = init_params(kp, input_dim, hidden_dim, mixture_size, targets)

    a_ref, m_ref, ls_ref = gmn_forward_ref(x, params, mixture_size, targets)

    # f32 operand path: tight check against the pure-JAX reference.
    fwd_f32 = jax.jit(functools.partial(
        gmn_forward, mixture_size=mixture_size, targets=targets,
        dtype=jnp.float32))
    a32, m32, ls32 = fwd_f32(x, params)
    jax.block_until_ready((a32, m32, ls32))
    assert a32.shape == (N, mixture_size)
    assert m32.shape == (N, targets, mixture_size)
    assert ls32.shape == (N, targets, mixture_size)
    assert jnp.allclose(a32, a_ref, atol=2e-5, rtol=2e-5)
    assert jnp.allclose(m32, m_ref, atol=2e-5, rtol=2e-5)
    assert jnp.allclose(ls32, ls_ref, atol=2e-5, rtol=2e-5)

    # Default bf16 operand path (f32 accumulation): looser tolerance.
    fwd_bf16 = jax.jit(functools.partial(
        gmn_forward, mixture_size=mixture_size, targets=targets))
    a16, m16, ls16 = fwd_bf16(x, params)
    jax.block_until_ready((a16, m16, ls16))
    assert a16.shape == (N, mixture_size)
    assert m16.shape == (N, targets, mixture_size)
    assert ls16.shape == (N, targets, mixture_size)
    assert jnp.allclose(a16, a_ref, atol=1e-1, rtol=1e-1)
    assert jnp.allclose(m16, m_ref, atol=1e-1, rtol=1e-1)
    assert jnp.allclose(ls16, ls_ref, atol=1e-1, rtol=1e-1)

    print("KERNEL_OK")
</pallas_src>

<mosaic_0001>
module attributes {stable_mosaic.version = 11 : i64} {
  func.func @_gmn_kernel(%arg0: i32, %arg1: memref<8x16xf32, #tpu.memory_space<vmem>>, %arg2: memref<16x128xf32, #tpu.memory_space<vmem>>, %arg3: memref<1x128xf32, #tpu.memory_space<vmem>>, %arg4: memref<128x128xf32, #tpu.memory_space<vmem>>, %arg5: memref<128x128xf32, #tpu.memory_space<vmem>>, %arg6: memref<8x4xf32, #tpu.memory_space<vmem>>, %arg7: memref<8x12xf32, #tpu.memory_space<vmem>>, %arg8: memref<8x12xf32, #tpu.memory_space<vmem>>) attributes {dimension_semantics = [#tpu.dimension_semantics<parallel>], iteration_bounds = array<i64: 1>, scalar_prefetch = 0 : i64, scratch_operands = 0 : i64, tpu.core_type = #tpu.core_type<tc>, window_params = [{transform_indices = @transform_0, window_bounds = array<i64: 8, 16>}, {pipeline_mode = #tpu.pipeline_mode<synchronous>, transform_indices = @transform_1, window_bounds = array<i64: 16, 128>}, {pipeline_mode = #tpu.pipeline_mode<synchronous>, transform_indices = @transform_2, window_bounds = array<i64: 1, 128>}, {pipeline_mode = #tpu.pipeline_mode<synchronous>, transform_indices = @transform_3, window_bounds = array<i64: 128, 128>}, {pipeline_mode = #tpu.pipeline_mode<synchronous>, transform_indices = @transform_4, window_bounds = array<i64: 128, 128>}, {transform_indices = @transform_5, window_bounds = array<i64: 8, 4>}, {transform_indices = @transform_6, window_bounds = array<i64: 8, 12>}, {transform_indices = @transform_7, window_bounds = array<i64: 8, 12>}]} {
    %0 = tpu.iota {dimensions = array<i32: 1>} : vector<1x128xi32>
    %c32_i32 = arith.constant 32 : i32
    %1 = vector.broadcast %c32_i32 : i32 to vector<1x128xi32>
    %2 = arith.cmpi eq, %0, %1 : vector<1x128xi32>
    %c0 = arith.constant 0 : index
    %c0_0 = arith.constant 0 : index
    %3 = vector.load %arg1[%c0, %c0_0] : memref<8x16xf32, #tpu.memory_space<vmem>>, vector<8x16xf32>
    %c0_1 = arith.constant 0 : index
    %c0_2 = arith.constant 0 : index
    %4 = vector.load %arg2[%c0_1, %c0_2] : memref<16x128xf32, #tpu.memory_space<vmem>>, vector<16x128xf32>
    %cst = arith.constant dense<0.000000e+00> : vector<8x128xf32>
    %5 = tpu.matmul %3, %4, %cst {dimension_numbers = #tpu.dot_dimension_numbers<[1], [0], [0], [1], [0, 0, 1, 1], [], []>} : vector<8x16xf32>, vector<16x128xf32>, vector<8x128xf32> -> vector<8x128xf32>
    %c0_3 = arith.constant 0 : index
    %c0_4 = arith.constant 0 : index
    %6 = vector.load %arg3[%c0_3, %c0_4] : memref<1x128xf32, #tpu.memory_space<vmem>>, vector<1x128xf32>
    %7 = vector.broadcast %6 : vector<1x128xf32> to vector<8x128xf32>
    %8 = arith.addf %5, %7 : vector<8x128xf32>
    %9 = math.tanh %8 : vector<8x128xf32>
    %cst_5 = arith.constant 1.000000e+00 : f32
    %10 = vector.shape_cast %2 : vector<1x128xi1> to vector<1x128xi1>
    %11 = vector.broadcast %10 : vector<1x128xi1> to vector<8x128xi1>
    %12 = vector.broadcast %cst_5 : f32 to vector<8x128xf32>
    %13 = arith.select %11, %12, %9 : vector<8x128xi1>, vector<8x128xf32>
    %c0_6 = arith.constant 0 : index
    %c0_7 = arith.constant 0 : index
    %14 = vector.load %arg4[%c0_6, %c0_7] : memref<128x128xf32, #tpu.memory_space<vmem>>, vector<128x128xf32>
    %cst_8 = arith.constant dense<0.000000e+00> : vector<8x128xf32>
    %15 = tpu.matmul %13, %14, %cst_8 {dimension_numbers = #tpu.dot_dimension_numbers<[1], [0], [0], [1], [0, 0, 1, 1], [], []>} : vector<8x128xf32>, vector<128x128xf32>, vector<8x128xf32> -> vector<8x128xf32>
    %c0_9 = arith.constant 0 : index
    %c0_10 = arith.constant 0 : index
    %16 = vector.load %arg5[%c0_9, %c0_10] : memref<128x128xf32, #tpu.memory_space<vmem>>, vector<128x128xf32>
    %cst_11 = arith.constant dense<0.000000e+00> : vector<8x128xf32>
    %17 = tpu.matmul %15, %16, %cst_11 {dimension_numbers = #tpu.dot_dimension_numbers<[1], [0], [0], [1], [0, 0, 1, 1], [], []>} : vector<8x128xf32>, vector<128x128xf32>, vector<8x128xf32> -> vector<8x128xf32>
    %18 = vector.extract_strided_slice %17 {offsets = [0, 0], sizes = [8, 4], strides = [1, 1]} : vector<8x128xf32> to vector<8x4xf32>
    %c0_12 = arith.constant 0 : index
    %c0_13 = arith.constant 0 : index
    %19 = vector.load %arg6[%c0_12, %c0_13] : memref<8x4xf32, #tpu.memory_space<vmem>>, vector<8x4xf32>
    tpu.vector_store %arg6[%c0_12, %c0_13], %18 {strides = array<i32>} : memref<8x4xf32, #tpu.memory_space<vmem>>, vector<8x4xf32>,
    %20 = vector.extract_strided_slice %17 {offsets = [0, 4], sizes = [8, 12], strides = [1, 1]} : vector<8x128xf32> to vector<8x12xf32>
    %cst_14 = arith.constant -5.000000e+00 : f32
    %21 = vector.broadcast %cst_14 : f32 to vector<8x12xf32>
    %22 = arith.maximumf %20, %21 : vector<8x12xf32>
    %c0_15 = arith.constant 0 : index
    %c0_16 = arith.constant 0 : index
    %23 = vector.load %arg7[%c0_15, %c0_16] : memref<8x12xf32, #tpu.memory_space<vmem>>, vector<8x12xf32>
    tpu.vector_store %arg7[%c0_15, %c0_16], %22 {strides = array<i32>} : memref<8x12xf32, #tpu.memory_space<vmem>>, vector<8x12xf32>,
    %24 = vector.extract_strided_slice %17 {offsets = [0, 16], sizes = [8, 12], strides = [1, 1]} : vector<8x128xf32> to vector<8x12xf32>
    %c0_17 = arith.constant 0 : index
    %c0_18 = arith.constant 0 : index
    %25 = vector.load %arg8[%c0_17, %c0_18] : memref<8x12xf32, #tpu.memory_space<vmem>>, vector<8x12xf32>
    tpu.vector_store %arg8[%c0_17, %c0_18], %24 {strides = array<i32>} : memref<8x12xf32, #tpu.memory_space<vmem>>, vector<8x12xf32>,
    return
  }
  func.func @transform_0(%arg0: i32) -> (i32, i32) {
    %c0_i32 = arith.constant 0 : i32
    %c0_i32_0 = arith.constant 0 : i32
    return %arg0, %c0_i32 : i32, i32
  }
  func.func @transform_1(%arg0: i32) -> (i32, i32) {
    %c0_i32 = arith.constant 0 : i32
    %c0_i32_0 = arith.constant 0 : i32
    %c0_i32_1 = arith.constant 0 : i32
    return %c0_i32, %c0_i32_0 : i32, i32
  }
  func.func @transform_2(%arg0: i32) -> (i32, i32) {
    %c0_i32 = arith.constant 0 : i32
    %c0_i32_0 = arith.constant 0 : i32
    %c0_i32_1 = arith.constant 0 : i32
    return %c0_i32, %c0_i32_0 : i32, i32
  }
  func.func @transform_3(%arg0: i32) -> (i32, i32) {
    %c0_i32 = arith.constant 0 : i32
    %c0_i32_0 = arith.constant 0 : i32
    %c0_i32_1 = arith.constant 0 : i32
    return %c0_i32, %c0_i32_0 : i32, i32
  }
  func.func @transform_4(%arg0: i32) -> (i32, i32) {
    %c0_i32 = arith.constant 0 : i32
    %c0_i32_0 = arith.constant 0 : i32
    %c0_i32_1 = arith.constant 0 : i32
    return %c0_i32, %c0_i32_0 : i32, i32
  }
  func.func @transform_5(%arg0: i32) -> (i32, i32) {
    %c0_i32 = arith.constant 0 : i32
    %c0_i32_0 = arith.constant 0 : i32
    return %arg0, %c0_i32 : i32, i32
  }
  func.func @transform_6(%arg0: i32) -> (i32, i32) {
    %c0_i32 = arith.constant 0 : i32
    %c0_i32_0 = arith.constant 0 : i32
    return %arg0, %c0_i32 : i32, i32
  }
  func.func @transform_7(%arg0: i32) -> (i32, i32) {
    %c0_i32 = arith.constant 0 : i32
    %c0_i32_0 = arith.constant 0 : i32
    return %arg0, %c0_i32 : i32, i32
  }
}

</mosaic_0001>

<bundles_post_ra>
// kernel: gmn_forward.1
= control target key start
LH: loop header
LB: loop body
LE: loop exit
PB: predicated region body
PF: predicated region fallthrough
CT: control target
= control target key end

     0   :  { %v486_v0 = vmov 0.0|0.0   ;;  %vm487_vm0 = vmmov 0   ;;  %v488_v3 = vmov 0.0   ;;  %vm36_vm1 = vcmask 130048   ;;  %s490_s20 = smov 112   ;;  %s668_s1 = inlined_call_operand.vmem [shape: f32[16,128], index: 1, kind: input, shape index: {}]   ;;  %s669_s3 = inlined_call_operand.vmem [shape: f32[128,128], index: 3, kind: input, shape index: {}]   ;;  %s670_s0 = inlined_call_operand.vmem [shape: f32[8,16], index: 0, kind: input, shape index: {}]   ;;  %s671_s4 = inlined_call_operand.vmem [shape: f32[128,128], index: 4, kind: input, shape index: {}]   ;;  %s672_s2 = inlined_call_operand.vmem [shape: f32[1,128], index: 2, kind: input, shape index: {}]   ;;  %s673_s5 = inlined_call_operand.vmem [shape: f32[8,4], index: 5, kind: output, shape index: {0}]   ;;  %s674_s6 = inlined_call_operand.vmem [shape: f32[8,12], index: 6, kind: output, shape index: {1}]   ;;  %s675_s7 = inlined_call_operand.vmem [shape: f32[8,12], index: 7, kind: output, shape index: {2}]  }
   0x1   :  { %428 = vmatprep.subr.bf16.mxu0 %v486_v0  ;;  %v27_v1 = vld [vmem:[%s668_s1] sm:$0xff]  ;;  %v28_v2 = vld [vmem:[%s668_s1 + $0x8] sm:$0xff]  ;;  %355 = vmatprep.mubr.msk.f32.mxu0 %vm487_vm0, %v488_v3  ;;  %v116_v7 = vld [vmem:[%s669_s3 + $0x10] sm:$0xff]  ;;  %v23_v58 = vlaneseq  ;;  %vm286_vm3 = vcmask 31744   ;;  %vm293_vm4 = vcmask 97280  }
   0x2   :  { %v429_v4 = vpack.c.bf16 %v28_v2, %v27_v1  ;;  %431 = vmatprep.subr.bf16.mxu1 %v486_v0  ;;  %v114_v5 = vld [vmem:[%s669_s3] sm:$0xff]  ;;  %v115_v6 = vld [vmem:[%s669_s3 + $0x8] sm:$0xff]  ;;  %390 = vmatprep.mubr.msk.f32.mxu1 %vm487_vm0, %v488_v3  ;;  %v117_v9 = vld [vmem:[%s669_s3 + $0x18] sm:$0xff] }
   0x3   :  { %v432_v8 = vpack.c.bf16 %v115_v6, %v114_v5  ;;  %v26_v10 = vld [vmem:[%s670_s0] sm:$0xff]  ;;  %v435_v11 = vpack.c.bf16 %v117_v9, %v116_v7  ;;  %v119_v13 = vld [vmem:[%s669_s3 + $0x28] sm:$0xff]  ;;  %v120_v15 = vld [vmem:[%s669_s3 + $0x30] sm:$0xff]  ;;  %v24_v59 = vand.u32 127, %v23_v58 }
   0x4   :  { %430 = vmatpush3.bf16.msra.mxu0 %v429_v4  ;;  %v118_v12 = vld [vmem:[%s669_s3 + $0x20] sm:$0xff]  ;;  %v121_v16 = vld [vmem:[%s669_s3 + $0x38] sm:$0xff]  ;;  %v123_v19 = vld [vmem:[%s669_s3 + $0x48] sm:$0xff] }
   0x5   :  { %433 = vmatpush3.bf16.msra.mxu1 %v432_v8  ;;  %455 = vmatprep.subr.bf16.mxu0 %v486_v0  ;;  %v438_v14 = vpack.c.bf16 %v119_v13, %v118_v12  ;;  %v441_v17 = vpack.c.bf16 %v121_v16, %v120_v15  ;;  %v122_v18 = vld [vmem:[%s669_s3 + $0x40] sm:$0xff]  ;;  %v124_v21 = vld [vmem:[%s669_s3 + $0x50] sm:$0xff]  ;;  %v125_v22 = vld [vmem:[%s669_s3 + $0x58] sm:$0xff]  ;;  %vm25_vm2 = vcmp.eq.s32.totalorder %v24_v59, 32 }
   0x6   :  { %434 = vmatprep.subr.bf16.mxu1 %v486_v0  ;;  %v444_v20 = vpack.c.bf16 %v123_v19, %v122_v18  ;;  %v447_v23 = vpack.c.bf16 %v125_v22, %v124_v21  ;;  %v126_v24 = vld [vmem:[%s669_s3 + $0x60] sm:$0xff]  ;;  %v127_v25 = vld [vmem:[%s669_s3 + $0x68] sm:$0xff]  ;;  %v128_v27 = vld [vmem:[%s669_s3 + $0x70] sm:$0xff] }
   0x7   :  { %356 = vmatmul.mubr.msk.f32.vlgmr.msra.gmra.mrb[0].mxu0 %vm36_vm1, %v26_v10  ;;  %v450_v26 = vpack.c.bf16 %v127_v25, %v126_v24  ;;  %v129_v28 = vld [vmem:[%s669_s3 + $0x78] sm:$0xff]  ;;  %v200_v30 = vld [vmem:[%s671_s4] sm:$0xff]  ;;  %v201_v31 = vld [vmem:[%s671_s4 + $0x8] sm:$0xff] }
   0x8   :  { %425 = vmatprep.mubr.msk.f32.mxu0 %vm487_vm0, %v488_v3  ;;  %v453_v29 = vpack.c.bf16 %v129_v28, %v128_v27  ;;  %v202_v32 = vld [vmem:[%s671_s4 + $0x10] sm:$0xff]  ;;  %v456_v33 = vpack.c.bf16 %v201_v31, %v200_v30  ;;  %v203_v34 = vld [vmem:[%s671_s4 + $0x18] sm:$0xff]  ;;  %v204_v36 = vld [vmem:[%s671_s4 + $0x20] sm:$0xff] }
   0x9   :  { %436 = vmatpush3.bf16.msra.mxu1 %v435_v11  ;;  %v459_v35 = vpack.c.bf16 %v203_v34, %v202_v32  ;;  %v205_v37 = vld [vmem:[%s671_s4 + $0x28] sm:$0xff]  ;;  %v206_v39 = vld [vmem:[%s671_s4 + $0x30] sm:$0xff]  ;;  %v207_v40 = vld [vmem:[%s671_s4 + $0x38] sm:$0xff] }
   0xa   :  { %437 = vmatprep.subr.bf16.mxu1 %v486_v0  ;;  %457 = vmatpush3.bf16.msra.mxu0 %v456_v33  ;;  %v462_v38 = vpack.c.bf16 %v205_v37, %v204_v36  ;;  %v465_v41 = vpack.c.bf16 %v207_v40, %v206_v39  ;;  %v208_v42 = vld [vmem:[%s671_s4 + $0x40] sm:$0xff]  ;;  %v209_v43 = vld [vmem:[%s671_s4 + $0x48] sm:$0xff]  ;;  %v210_v45 = vld [vmem:[%s671_s4 + $0x50] sm:$0xff] }
   0xb   :  { %458 = vmatprep.subr.bf16.mxu0 %v486_v0  ;;  %v468_v44 = vpack.c.bf16 %v209_v43, %v208_v42  ;;  %v211_v46 = vld [vmem:[%s671_s4 + $0x58] sm:$0xff]  ;;  %v212_v48 = vld [vmem:[%s671_s4 + $0x60] sm:$0xff]  ;;  %v213_v49 = vld [vmem:[%s671_s4 + $0x68] sm:$0xff] }
   0xc   :  { %v471_v47 = vpack.c.bf16 %v211_v46, %v210_v45  ;;  %v474_v50 = vpack.c.bf16 %v213_v49, %v212_v48  ;;  %v214_v51 = vld [vmem:[%s671_s4 + $0x70] sm:$0xff]  ;;  %v215_v52 = vld [vmem:[%s671_s4 + $0x78] sm:$0xff]  ;;  %v312_v54 = vld [vmem:[%s672_s2] ss:$0 sm:$0xff]  ;;  %s489_s2 = smov 124  }
   0xd   :  { %439 = vmatpush3.bf16.msra.mxu1 %v438_v14  ;;  %v477_v53 = vpack.c.bf16 %v215_v52, %v214_v51 }
   0xe   :  { %440 = vmatprep.subr.bf16.mxu1 %v486_v0  ;;  %460 = vmatpush3.bf16.msra.mxu0 %v459_v35 }
   0xf   :  { %461 = vmatprep.subr.bf16.mxu0 %v486_v0 }
  0x11   :  { %442 = vmatpush3.bf16.msra.mxu1 %v441_v17 }
  0x12   :  { %443 = vmatprep.subr.bf16.mxu1 %v486_v0  ;;  %463 = vmatpush3.bf16.msra.mxu0 %v462_v38 }
  0x13   :  { %464 = vmatprep.subr.bf16.mxu0 %v486_v0 }
  0x15   :  { %445 = vmatpush3.bf16.msra.mxu1 %v444_v20 }
  0x16   :  { %446 = vmatprep.subr.bf16.mxu1 %v486_v0  ;;  %466 = vmatpush3.bf16.msra.mxu0 %v465_v41 }
  0x17   :  { %467 = vmatprep.subr.bf16.mxu0 %v486_v0 }
  0x19   :  { %448 = vmatpush3.bf16.msra.mxu1 %v447_v23 }
  0x1a   :  { %449 = vmatprep.subr.bf16.mxu1 %v486_v0  ;;  %469 = vmatpush3.bf16.msra.mxu0 %v468_v44 }
  0x1b   :  { %470 = vmatprep.subr.bf16.mxu0 %v486_v0 }
  0x1d   :  { %451 = vmatpush3.bf16.msra.mxu1 %v450_v26 }
  0x1e   :  { %452 = vmatprep.subr.bf16.mxu1 %v486_v0  ;;  %472 = vmatpush3.bf16.msra.mxu0 %v471_v47 }
  0x1f   :  { %473 = vmatprep.subr.bf16.mxu0 %v486_v0 }
  0x21   :  { %454 = vmatpush3.bf16.msra.mxu1 %v453_v29 }
  0x22   :  { %475 = vmatpush3.bf16.msra.mxu0 %v474_v50 }
  0x23   :  { %476 = vmatprep.subr.bf16.mxu0 %v486_v0 }
  0x26   :  { %478 = vmatpush3.bf16.msra.mxu0 %v477_v53 }
  0xda   :  { %v106_v55 = vpop.f32.mrb[0].mxu0 }
  0xdb   :  { %v107_v56 = vadd.f32 %v312_v54, %v106_v55  ;;  %v357_v57 = vpop.f32.mrb[1].mxu0 }
  0xdd   :  { %484 = vtanh.f32 %v107_v56 }
  0xe7   :  { %v485_v60 = vpop.eup %484 }
  0xe8   :  { %v113_v61 = vsel %vm25_vm2, 1.0, %v485_v60 }
  0xe9   :  { %391 = vmatmul.mubr.f32.vlgmr.msra.gmra.mrb[0].mxu1 %v113_v61 }
 0x1bc   :  { %v196_v62 = vpop.f32.mrb[0].mxu1 }
 0x1bd   :  { %v392_v63 = vpop.f32.mrb[1].mxu1  ;;  %426 = vmatmul.mubr.f32.vlgmr.msra.gmra.mrb[2].mxu0 %v196_v62 }
 0x290   :  { %v282_v0 = vpop.f32.mrb[2].mxu0 }
 0x291   :  { %287 = vst.msk [vmem:[%s673_s5] sm:$0xff] %vm286_vm3, %v282_v0  ;;  %v427_v1 = vpop.f32.mrb[3].mxu0  ;;  %v288_v2 = vmax.f32 %v282_v0, -5.0 }
 0x293   :  { %290 = vrot.lane.b32.xlu0 %v288_v2, %s489_s2 }
 0x297   :  { %296 = vrot.lane.b32.xlu0 %v282_v0, %s490_s20 }
 0x305   :  { %v291_v3 = vpop.permute.xlu0 %290 }
 0x306   :  { %294 = vst.msk [vmem:[%s674_s6] sm:$0xff] %vm293_vm4, %v291_v3 }
 0x309   :  { %v297_v4 = vpop.permute.xlu0 %296 }
 0x30a   :  { %299 = vst.msk [vmem:[%s675_s7] sm:$0xff] %vm293_vm4, %v297_v4 }

</bundles_post_ra>
